<compile_context>
chip_gen: v5e
topology: v5e:2x2
jax: 0.10.0
libtpu: 0.0.40
codegen_flags: <defaults>
</compile_context>

<pallas_src>
import math

import jax
import jax.numpy as jnp
from jax.experimental import pallas as pl
from jax.experimental.pallas import tpu as pltpu


def _fused_transpose_scale_relu_kernel(s_ref, x0_ref, x1_ref, o_ref):
    """Fused transpose + per-channel attention scale + ReLU.

    s_ref : (2,) f32 in SMEM        -- per-channel sigmoid attention scalars.
    x0_ref: (tile_n, tile_f) VMEM   -- tile of input 0 in its natural (N, F) layout.
    x1_ref: (tile_n, tile_f) VMEM   -- tile of input 1.
    o_ref : (2, tile_f, tile_n)     -- output tile of the (2, F, N) channel tensor.
    """
    o_ref[0] = jnp.maximum(x0_ref[...].T * s_ref[0], 0.0)   # XLU transpose + VPU
    o_ref[1] = jnp.maximum(x1_ref[...].T * s_ref[1], 0.0)


def _scale_relu_kernel(s_ref, x_ref, o_ref):
    """Fallback: per-channel scale + ReLU on a pre-transposed (2, F, N) tensor."""
    c = pl.program_id(0)                 # channel index
    o_ref[...] = jnp.maximum(x_ref[...] * s_ref[c], 0.0)


def _pick_tile(dim, cap=512):
    """Largest tile <= cap that evenly divides `dim` (caller ensures dim % 128 == 0)."""
    if dim <= cap:
        return dim
    for t in (cap, 256, 128):
        if dim % t == 0:
            return t
    return 128


@jax.jit
def hgcn_attention(x0, x1, w1, b1, w2, b2):
    """x0, x1: (N, F). w1: (2, H), b1: (H,), w2: (H, 2), b2: (2,). Returns (2, F, N)."""
    N, F = x0.shape
    x0 = x0.astype(jnp.float32)
    x1 = x1.astype(jnp.float32)

    # --- Channel attention scalars: global average pool + 2->H->2 MLP + sigmoid.
    #     Single fused XLA reduce over the data (unavoidable first pass) plus a
    #     handful of FLOPs; computed exactly once, outside the kernel.
    m = jnp.stack([jnp.mean(x0), jnp.mean(x1)]).reshape(1, 2)
    h = jax.nn.relu(m @ w1 + b1)
    s = jax.nn.sigmoid(h @ w2 + b2).reshape(2).astype(jnp.float32)       # (2,)

    if F % 128 == 0 and N % 128 == 0:
        # --- Fused path: transpose + scale + ReLU inside the kernel.
        tile_f = _pick_tile(F)
        tile_n = _pick_tile(N)
        grid = (F // tile_f, N // tile_n)
        return pl.pallas_call(
            _fused_transpose_scale_relu_kernel,
            grid=grid,
            in_specs=[
                # Two attention scalars live in SMEM for the whole kernel.
                pl.BlockSpec(memory_space=pltpu.MemorySpace.SMEM),
                # x0/x1 streamed in their natural (N, F) layout, auto double-buffered.
                pl.BlockSpec((tile_n, tile_f), lambda i, j: (j, i)),
                pl.BlockSpec((tile_n, tile_f), lambda i, j: (j, i)),
            ],
            # Lane-dense (last dim = tile_n, multiple of 128) output blocks.
            out_specs=pl.BlockSpec((2, tile_f, tile_n), lambda i, j: (0, i, j)),
            out_shape=jax.ShapeDtypeStruct((2, F, N), jnp.float32),
            compiler_params=pltpu.CompilerParams(
                dimension_semantics=("parallel", "parallel")),
        )(s, x0, x1)

    # --- Fallback (non-128-aligned shapes): transpose once at the XLA level,
    #     then stream (channel, F-tile, N-tile) blocks through scale + ReLU.
    xm = jnp.stack([x0.T, x1.T], axis=0)                                 # (2, F, N)
    tile_f = F if (F <= 512 or F % 8 != 0) else 512
    tile_n = N if (N <= 1024 or N % 128 != 0) else 1024
    grid = (2, pl.cdiv(F, tile_f), pl.cdiv(N, tile_n))
    return pl.pallas_call(
        _scale_relu_kernel,
        grid=grid,
        in_specs=[
            pl.BlockSpec(memory_space=pltpu.MemorySpace.SMEM),
            pl.BlockSpec((1, tile_f, tile_n), lambda c, i, j: (c, i, j)),
        ],
        out_specs=pl.BlockSpec((1, tile_f, tile_n), lambda c, i, j: (c, i, j)),
        out_shape=jax.ShapeDtypeStruct((2, F, N), jnp.float32),
        compiler_params=pltpu.CompilerParams(
            dimension_semantics=("parallel", "parallel", "parallel")),
    )(s, xm)


if __name__ == "__main__":
    key = jax.random.PRNGKey(0)
    k0, k1, kw1, kb1, kw2, kb2 = jax.random.split(key, 6)

    # Small shapes consistent with the module: input_list[i] is (N, F); hiddim = 64.
    N, F, H = 256, 128, 64

    x0 = jax.random.normal(k0, (N, F), jnp.float32)
    x1 = jax.random.normal(k1, (N, F), jnp.float32)

    # Deterministic synthetic params (PyTorch-Linear-style uniform init bounds).
    bound1 = 1.0 / math.sqrt(2.0)
    w1 = jax.random.uniform(kw1, (2, H), jnp.float32, -bound1, bound1)   # fc_x1 (in=2, out=H)
    b1 = jax.random.uniform(kb1, (H,), jnp.float32, -bound1, bound1)
    bound2 = 1.0 / math.sqrt(float(H))
    w2 = jax.random.uniform(kw2, (H, 2), jnp.float32, -bound2, bound2)   # fc_x2 (in=H, out=2)
    b2 = jax.random.uniform(kb2, (2,), jnp.float32, -bound2, bound2)

    out = jax.block_until_ready(hgcn_attention(x0, x1, w1, b1, w2, b2))
    assert out.shape == (2, F, N)

    # Pure-JAX reference of the torch forward for a sanity check.
    m_ref = jnp.stack([x0.mean(), x1.mean()]).reshape(1, 2)
    h_ref = jax.nn.relu(m_ref @ w1 + b1)
    s_chk = jax.nn.sigmoid(h_ref @ w2 + b2).reshape(2, 1, 1)
    ref = jax.nn.relu(s_chk * jnp.stack([x0.T, x1.T]))                   # (2, F, N)
    assert jnp.allclose(out, ref, atol=1e-5), "Pallas kernel mismatch vs reference"

    print("KERNEL_OK")
</pallas_src>

<mosaic_0001>
module attributes {stable_mosaic.version = 11 : i64} {
  func.func @_fused_transpose_scale_relu_kernel(%arg0: i32, %arg1: i32, %arg2: memref<2xf32, #tpu.memory_space<smem>>, %arg3: memref<256x128xf32, #tpu.memory_space<vmem>>, %arg4: memref<256x128xf32, #tpu.memory_space<vmem>>, %arg5: memref<2x128x256xf32, #tpu.memory_space<vmem>>) attributes {dimension_semantics = [#tpu.dimension_semantics<parallel>, #tpu.dimension_semantics<parallel>], iteration_bounds = array<i64: 1, 1>, scalar_prefetch = 0 : i64, scratch_operands = 0 : i64, tpu.core_type = #tpu.core_type<tc>, window_params = [{transform_indices = @transform_0, window_bounds = array<i64: 2>}, {transform_indices = @transform_1, window_bounds = array<i64: 256, 128>}, {transform_indices = @transform_2, window_bounds = array<i64: 256, 128>}, {transform_indices = @transform_3, window_bounds = array<i64: 2, 128, 256>}]} {
    %c0 = arith.constant 0 : index
    %c0_0 = arith.constant 0 : index
    %0 = vector.load %arg3[%c0, %c0_0] : memref<256x128xf32, #tpu.memory_space<vmem>>, vector<256x128xf32>
    %1 = tpu.transpose %0, [1, 0] : vector<256x128xf32> -> vector<128x256xf32>
    %c0_1 = arith.constant 0 : index
    %2 = memref.load %arg2[%c0_1] : memref<2xf32, #tpu.memory_space<smem>>
    %3 = vector.broadcast %2 : f32 to vector<128x256xf32>
    %4 = arith.mulf %1, %3 : vector<128x256xf32>
    %cst = arith.constant 0.000000e+00 : f32
    %5 = vector.broadcast %cst : f32 to vector<128x256xf32>
    %6 = arith.maximumf %4, %5 : vector<128x256xf32>
    %c0_2 = arith.constant 0 : index
    %c0_3 = arith.constant 0 : index
    %c0_4 = arith.constant 0 : index
    %7 = vector.load %arg5[%c0_2, %c0_3, %c0_4] : memref<2x128x256xf32, #tpu.memory_space<vmem>>, vector<1x128x256xf32>
    %8 = vector.shape_cast %7 : vector<1x128x256xf32> to vector<128x256xf32>
    %9 = vector.shape_cast %6 : vector<128x256xf32> to vector<1x128x256xf32>
    tpu.vector_store %arg5[%c0_2, %c0_3, %c0_4], %9 {strides = array<i32>} : memref<2x128x256xf32, #tpu.memory_space<vmem>>, vector<1x128x256xf32>,
    %c0_5 = arith.constant 0 : index
    %c0_6 = arith.constant 0 : index
    %10 = vector.load %arg4[%c0_5, %c0_6] : memref<256x128xf32, #tpu.memory_space<vmem>>, vector<256x128xf32>
    %11 = tpu.transpose %10, [1, 0] : vector<256x128xf32> -> vector<128x256xf32>
    %c1 = arith.constant 1 : index
    %12 = memref.load %arg2[%c1] : memref<2xf32, #tpu.memory_space<smem>>
    %13 = vector.broadcast %12 : f32 to vector<128x256xf32>
    %14 = arith.mulf %11, %13 : vector<128x256xf32>
    %cst_7 = arith.constant 0.000000e+00 : f32
    %15 = vector.broadcast %cst_7 : f32 to vector<128x256xf32>
    %16 = arith.maximumf %14, %15 : vector<128x256xf32>
    %c1_8 = arith.constant 1 : index
    %c0_9 = arith.constant 0 : index
    %c0_10 = arith.constant 0 : index
    %17 = vector.load %arg5[%c1_8, %c0_9, %c0_10] : memref<2x128x256xf32, #tpu.memory_space<vmem>>, vector<1x128x256xf32>
    %18 = vector.shape_cast %17 : vector<1x128x256xf32> to vector<128x256xf32>
    %19 = vector.shape_cast %16 : vector<128x256xf32> to vector<1x128x256xf32>
    tpu.vector_store %arg5[%c1_8, %c0_9, %c0_10], %19 {strides = array<i32>} : memref<2x128x256xf32, #tpu.memory_space<vmem>>, vector<1x128x256xf32>,
    return
  }
  func.func @transform_0(%arg0: i32, %arg1: i32) -> i32 {
    %c0_i32 = arith.constant 0 : i32
    %c0_i32_0 = arith.constant 0 : i32
    return %c0_i32 : i32
  }
  func.func @transform_1(%arg0: i32, %arg1: i32) -> (i32, i32) {
    %c0_i32 = arith.constant 0 : i32
    return %arg1, %arg0 : i32, i32
  }
  func.func @transform_2(%arg0: i32, %arg1: i32) -> (i32, i32) {
    %c0_i32 = arith.constant 0 : i32
    return %arg1, %arg0 : i32, i32
  }
  func.func @transform_3(%arg0: i32, %arg1: i32) -> (i32, i32, i32) {
    %c0_i32 = arith.constant 0 : i32
    %c0_i32_0 = arith.constant 0 : i32
    return %c0_i32, %arg0, %arg1 : i32, i32, i32
  }
}

</mosaic_0001>

<bundles_post_ra>
// kernel: hgcn_attention.1
= control target key start
LH: loop header
LB: loop body
LE: loop exit
PB: predicated region body
PF: predicated region fallthrough
CT: control target
= control target key end

     0   :  { %8 = vsyncpa [#allocation4], 0  ;;  %s771_s0 = inlined_call_operand.vmem [shape: f32[2], index: 0, kind: input, shape index: {}]   ;;  %s772_s1 = inlined_call_operand.vmem [shape: f32[256,128], index: 1, kind: input, shape index: {}]   ;;  %s773_s2 = inlined_call_operand.vmem [shape: f32[256,128], index: 2, kind: input, shape index: {}]   ;;  %s774_s3 = inlined_call_operand.hbm [shape: f32[2,128,256], index: 3, kind: output, shape index: {}]  }
   0x1   :  { %9 = vsyncpa [#allocation3], 0  ;;  %s15_s14 = sshll.u32 %s771_s0, 4  ;;  %s481_s15 = smov [#allocation2]   ;;  %s16_s14 = int_to_ptr.vmem [resolvable:$true] %s15_s14 }
   0x2   :  { %18 = dma.vmem_to_smem %s16_s14, 16, %s481_s15, [#allocation4]  }
   0x3   :  { %477 = dma.done.wait [#allocation4], 16  }
   0x4   :  { %478 = vsyncadd [#allocation4], 4294967280 }
   0x5   :  { %27 = sfence }
   0x6   :  { %v28_v0 = vld [vmem:[%s772_s1] sm:$0xff]  ;;  %v29_v1 = vld [vmem:[%s772_s1 + $0x8] sm:$0xff]  ;;  %v30_v2 = vld [vmem:[%s772_s1 + $0x10] sm:$0xff]  ;;  %s124_s29 = sld [smem:[#allocation2]]  ;;  %s423_s8 = sshll.u32 %s774_s3, 4  ;;  %s424_s8 = int_to_ptr.hbm [resolvable:$true] %s423_s8 }
   0x7   :  { %60 = vxpose.xlu0.b32.start [1/16] %v28_v0, 128  ;;  %v31_v3 = vld [vmem:[%s772_s1 + $0x18] sm:$0xff]  ;;  %v32_v4 = vld [vmem:[%s772_s1 + $0x20] sm:$0xff]  ;;  %v33_v5 = vld [vmem:[%s772_s1 + $0x28] sm:$0xff]  ;;  %s436_s4 = sld [smem:[#allocation2 + $0x1]]  ;;  %s483_s9 = smov 256  }
   0x8   :  { %v34_v6 = vld [vmem:[%s772_s1 + $0x30] sm:$0xff]  ;;  %v35_v7 = vld [vmem:[%s772_s1 + $0x38] sm:$0xff]  ;;  %v36_v8 = vld [vmem:[%s772_s1 + $0x40] sm:$0xff]  ;;  %s484_s10 = smov 16  }
   0x9   :  { %v37_v9 = vld [vmem:[%s772_s1 + $0x48] sm:$0xff]  ;;  %v38_v10 = vld [vmem:[%s772_s1 + $0x50] sm:$0xff]  ;;  %v39_v11 = vld [vmem:[%s772_s1 + $0x58] sm:$0xff] }
   0xa   :  { %v44_v12 = vld [vmem:[%s772_s1 + $0x80] sm:$0xff]  ;;  %v45_v14 = vld [vmem:[%s772_s1 + $0x88] sm:$0xff]  ;;  %v46_v17 = vld [vmem:[%s772_s1 + $0x90] sm:$0xff] }
   0xb   :  { %92 = vxpose.xlu1.b32.start [1/16] %v44_v12, 128  ;;  %v40_v13 = vld [vmem:[%s772_s1 + $0x60] sm:$0xff]  ;;  %v41_v15 = vld [vmem:[%s772_s1 + $0x68] sm:$0xff]  ;;  %v42_v18 = vld [vmem:[%s772_s1 + $0x70] sm:$0xff] }
   0xc   :  { %v222_v16 = vld [vmem:[%s773_s2] sm:$0xff]  ;;  %v223_v19 = vld [vmem:[%s773_s2 + $0x8] sm:$0xff]  ;;  %v47_v20 = vld [vmem:[%s772_s1 + $0x98] sm:$0xff]  ;;  %v622_v38 = vstv %s124_s29 }
   0xd   :  { %254 = vxpose.xlu2.b32.start [1/16] %v222_v16, 128  ;;  %v43_v21 = vld [vmem:[%s772_s1 + $0x78] sm:$0xff]  ;;  %v224_v22 = vld [vmem:[%s773_s2 + $0x10] sm:$0xff]  ;;  %v48_v23 = vld [vmem:[%s772_s1 + $0xa0] sm:$0xff] }
   0xe   :  { %v238_v24 = vld [vmem:[%s773_s2 + $0x80] sm:$0xff]  ;;  %v225_v25 = vld [vmem:[%s773_s2 + $0x18] sm:$0xff]  ;;  %v239_v26 = vld [vmem:[%s773_s2 + $0x88] sm:$0xff] }
   0xf   :  { %61 = vxpose.xlu0.b32.cont [2/16] %v29_v1, 128  ;;  %v49_v27 = vld [vmem:[%s772_s1 + $0xa8] sm:$0xff]  ;;  %v226_v28 = vld [vmem:[%s773_s2 + $0x20] sm:$0xff]  ;;  %v240_v29 = vld [vmem:[%s773_s2 + $0x90] sm:$0xff] }
  0x10   :  { %v50_v30 = vld [vmem:[%s772_s1 + $0xb0] sm:$0xff]  ;;  %v227_v31 = vld [vmem:[%s773_s2 + $0x28] sm:$0xff]  ;;  %v241_v32 = vld [vmem:[%s773_s2 + $0x98] sm:$0xff] }
  0x11   :  { %v51_v33 = vld [vmem:[%s772_s1 + $0xb8] sm:$0xff]  ;;  %v228_v34 = vld [vmem:[%s773_s2 + $0x30] sm:$0xff]  ;;  %v242_v35 = vld [vmem:[%s773_s2 + $0xa0] sm:$0xff] }
  0x12   :  { %v52_v36 = vld [vmem:[%s772_s1 + $0xc0] sm:$0xff]  ;;  %v229_v37 = vld [vmem:[%s773_s2 + $0x38] sm:$0xff]  ;;  %v243_v41 = vld [vmem:[%s773_s2 + $0xa8] sm:$0xff] }
  0x13   :  { %93 = vxpose.xlu1.b32.cont [2/16] %v45_v14, 128  ;;  %v53_v43 = vld [vmem:[%s772_s1 + $0xc8] sm:$0xff]  ;;  %v230_v44 = vld [vmem:[%s773_s2 + $0x40] sm:$0xff]  ;;  %v244_v47 = vld [vmem:[%s773_s2 + $0xb0] sm:$0xff] }
  0x14   :  { %v54_v49 = vld [vmem:[%s772_s1 + $0xd0] sm:$0xff]  ;;  %v231_v50 = vld [vmem:[%s773_s2 + $0x48] sm:$0xff]  ;;  %v245_v53 = vld [vmem:[%s773_s2 + $0xb8] sm:$0xff] }
  0x15   :  { %255 = vxpose.xlu2.b32.cont [2/16] %v223_v19, 128  ;;  %v55_v55 = vld [vmem:[%s772_s1 + $0xd8] sm:$0xff]  ;;  %v232_v56 = vld [vmem:[%s773_s2 + $0x50] sm:$0xff]  ;;  %v246_v59 = vld [vmem:[%s773_s2 + $0xc0] sm:$0xff] }
  0x16   :  { %v56_v61 = vld [vmem:[%s772_s1 + $0xe0] sm:$0xff]  ;;  %v233_v62 = vld [vmem:[%s773_s2 + $0x58] sm:$0xff]  ;;  %v247_v1 = vld [vmem:[%s773_s2 + $0xc8] sm:$0xff] }
  0x17   :  { %62 = vxpose.xlu0.b32.cont [3/16] %v30_v2, 128  ;;  %v236_v16 = vld [vmem:[%s773_s2 + $0x70] sm:$0xff]  ;;  %v250_v19 = vld [vmem:[%s773_s2 + $0xe0] sm:$0xff] }
  0x1b   :  { %94 = vxpose.xlu1.b32.cont [3/16] %v46_v17, 128 }
  0x1d   :  { %256 = vxpose.xlu2.b32.cont [3/16] %v224_v22, 128 }
  0x1f   :  { %63 = vxpose.xlu0.b32.cont [4/16] %v31_v3, 128  ;;  %v57_v3 = vld [vmem:[%s772_s1 + $0xe8] sm:$0xff] }
  0x23   :  { %95 = vxpose.xlu1.b32.cont [4/16] %v47_v20, 128 }
  0x25   :  { %257 = vxpose.xlu2.b32.cont [4/16] %v225_v25, 128 }
  0x27   :  { %64 = vxpose.xlu0.b32.cont [5/16] %v32_v4, 128  ;;  %v234_v4 = vld [vmem:[%s773_s2 + $0x60] sm:$0xff] }
  0x2b   :  { %96 = vxpose.xlu1.b32.cont [5/16] %v48_v23, 128 }
  0x2d   :  { %258 = vxpose.xlu2.b32.cont [5/16] %v226_v28, 128  ;;  %v252_v28 = vld [vmem:[%s773_s2 + $0xf0] sm:$0xff] }
  0x2f   :  { %65 = vxpose.xlu0.b32.cont [6/16] %v33_v5, 128 }
  0x33   :  { %97 = vxpose.xlu1.b32.cont [6/16] %v49_v27, 128 }
  0x35   :  { %259 = vxpose.xlu2.b32.cont [6/16] %v227_v31, 128 }
  0x37   :  { %66 = vxpose.xlu0.b32.cont [7/16] %v34_v6, 128 }
  0x3b   :  { %98 = vxpose.xlu1.b32.cont [7/16] %v50_v30, 128 }
  0x3d   :  { %260 = vxpose.xlu2.b32.cont [7/16] %v228_v34, 128 }
  0x3f   :  { %67 = vxpose.xlu0.b32.cont [8/16] %v35_v7, 128  ;;  %v248_v7 = vld [vmem:[%s773_s2 + $0xd0] sm:$0xff] }
  0x43   :  { %99 = vxpose.xlu1.b32.cont [8/16] %v51_v33, 128 }
  0x45   :  { %261 = vxpose.xlu2.b32.cont [8/16] %v229_v37, 128  ;;  %v714_v37 = vstv %s436_s4 }
  0x47   :  { %68 = vxpose.xlu0.b32.cont [9/16] %v36_v8, 128 }
  0x4b   :  { %100 = vxpose.xlu1.b32.cont [9/16] %v52_v36, 128 }
  0x4d   :  { %262 = vxpose.xlu2.b32.cont [9/16] %v230_v44, 128 }
  0x4f   :  { %69 = vxpose.xlu0.b32.cont [10/16] %v37_v9, 128  ;;  %v58_v9 = vld [vmem:[%s772_s1 + $0xf0] sm:$0xff] }
  0x53   :  { %101 = vxpose.xlu1.b32.cont [10/16] %v53_v43, 128 }
  0x55   :  { %263 = vxpose.xlu2.b32.cont [10/16] %v231_v50, 128 }
  0x57   :  { %70 = vxpose.xlu0.b32.cont [11/16] %v38_v10, 128  ;;  %v235_v10 = vld [vmem:[%s773_s2 + $0x68] sm:$0xff] }
  0x5b   :  { %102 = vxpose.xlu1.b32.cont [11/16] %v54_v49, 128 }
  0x5d   :  { %264 = vxpose.xlu2.b32.cont [11/16] %v232_v56, 128 }
  0x5f   :  { %71 = vxpose.xlu0.b32.cont [12/16] %v39_v11, 128 }
  0x63   :  { %103 = vxpose.xlu1.b32.cont [12/16] %v55_v55, 128 }
  0x65   :  { %265 = vxpose.xlu2.b32.cont [12/16] %v233_v62, 128 }
  0x67   :  { %72 = vxpose.xlu0.b32.cont [13/16] %v40_v13, 128  ;;  %v249_v13 = vld [vmem:[%s773_s2 + $0xd8] sm:$0xff] }
  0x6b   :  { %104 = vxpose.xlu1.b32.cont [13/16] %v56_v61, 128 }
  0x6d   :  { %266 = vxpose.xlu2.b32.cont [13/16] %v234_v4, 128 }
  0x6f   :  { %73 = vxpose.xlu0.b32.cont [14/16] %v41_v15, 128  ;;  %v59_v15 = vld [vmem:[%s772_s1 + $0xf8] sm:$0xff] }
  0x73   :  { %105 = vxpose.xlu1.b32.cont [14/16] %v57_v3, 128 }
  0x75   :  { %267 = vxpose.xlu2.b32.cont [14/16] %v235_v10, 128 }
  0x77   :  { %74 = vxpose.xlu0.b32.cont [15/16] %v42_v18, 128 }
  0x7b   :  { %106 = vxpose.xlu1.b32.cont [15/16] %v58_v9, 128 }
  0x7d   :  { %268 = vxpose.xlu2.b32.cont [15/16] %v236_v16, 128 }
  0x7f   :  { %75 = vxpose.xlu0.b32.end [16/16] %v43_v21, 128  ;;  %v237_v21 = vld [vmem:[%s773_s2 + $0x78] sm:$0xff] }
  0x83   :  { %107 = vxpose.xlu1.b32.end [16/16] %v59_v15, 128 }
  0x85   :  { %269 = vxpose.xlu2.b32.end [16/16] %v237_v21, 128 }
  0x87   :  { %286 = vxpose.xlu0.b32.start [1/16] %v238_v24, 128  ;;  %v251_v24 = vld [vmem:[%s773_s2 + $0xe8] sm:$0xff] }
  0x8f   :  { %287 = vxpose.xlu0.b32.cont [2/16] %v239_v26, 128 }
  0x97   :  { %288 = vxpose.xlu0.b32.cont [3/16] %v240_v29, 128 }
  0x9f   :  { %289 = vxpose.xlu0.b32.cont [4/16] %v241_v32, 128  ;;  %v253_v32 = vld [vmem:[%s773_s2 + $0xf8] sm:$0xff]  ;;  %s482_s2 = smov [#allocation5]  }
  0xa0   :  { %s421_s5 = sshll.u32 %s482_s2, 4  ;;  %s422_s5 = int_to_ptr.vmem [resolvable:$true] %s421_s5 }
  0xa7   :  { %290 = vxpose.xlu0.b32.cont [5/16] %v242_v35, 128 }
  0xab   :  { %v76_v39 = vpop.trf.xlu0 }
  0xac   :  { %v126_v40 = vmul.f32 %v622_v38, %v76_v39  ;;  %v270_v39 = vpop.trf.xlu2 }
  0xae   :  { %v158_v42 = vmax.f32 %v126_v40, 0.0 }
  0xaf   :  { %291 = vxpose.xlu0.b32.cont [6/16] %v243_v41, 128  ;;  %v320_v41 = vmul.f32 %v714_v37, %v270_v39 }
  0xb0   :  { %190 = vst [vmem:[#allocation5] sm:$0xff] %v158_v42  ;;  %v108_v42 = vpop.trf.xlu1 }
  0xb1   :  { %v127_v44 = vmul.f32 %v622_v38, %v108_v42 }
  0xb3   :  { %v77_v45 = vpop.trf.xlu0 }
  0xb4   :  { %v128_v46 = vmul.f32 %v622_v38, %v77_v45  ;;  %v352_v45 = vmax.f32 %v320_v41, 0.0 }
  0xb6   :  { %v160_v48 = vmax.f32 %v128_v46, 0.0  ;;  %385 = vst [vmem:[#allocation5 + $0x100] sm:$0xff] %v352_v45 }
  0xb7   :  { %292 = vxpose.xlu0.b32.cont [7/16] %v244_v47, 128  ;;  %v159_v47 = vmax.f32 %v127_v44, 0.0 }
  0xb8   :  { %192 = vst [vmem:[#allocation5 + $0x10] sm:$0xff] %v160_v48  ;;  %v271_v48 = vpop.trf.xlu2 }
  0xb9   :  { %191 = vst [vmem:[#allocation5 + $0x8] sm:$0xff] %v159_v47  ;;  %v322_v50 = vmul.f32 %v714_v37, %v271_v48 }
  0xbb   :  { %v78_v51 = vpop.trf.xlu0 }
  0xbc   :  { %v130_v52 = vmul.f32 %v622_v38, %v78_v51  ;;  %v109_v51 = vpop.trf.xlu1 }
  0xbe   :  { %v162_v54 = vmax.f32 %v130_v52, 0.0 }
  0xbf   :  { %293 = vxpose.xlu0.b32.cont [8/16] %v245_v53, 128  ;;  %v129_v53 = vmul.f32 %v622_v38, %v109_v51 }
  0xc0   :  { %194 = vst [vmem:[#allocation5 + $0x20] sm:$0xff] %v162_v54  ;;  %v354_v54 = vmax.f32 %v322_v50, 0.0 }
  0xc1   :  { %v161_v56 = vmax.f32 %v129_v53, 0.0 }
  0xc2   :  { %387 = vst [vmem:[#allocation5 + $0x110] sm:$0xff] %v354_v54 }
  0xc3   :  { %v79_v57 = vpop.trf.xlu0  ;;  %193 = vst [vmem:[#allocation5 + $0x18] sm:$0xff] %v161_v56 }
  0xc4   :  { %v132_v58 = vmul.f32 %v622_v38, %v79_v57  ;;  %v272_v57 = vpop.trf.xlu2 }
  0xc6   :  { %v164_v60 = vmax.f32 %v132_v58, 0.0 }
  0xc7   :  { %294 = vxpose.xlu0.b32.cont [9/16] %v246_v59, 128  ;;  %v324_v59 = vmul.f32 %v714_v37, %v272_v57 }
  0xc8   :  { %196 = vst [vmem:[#allocation5 + $0x30] sm:$0xff] %v164_v60  ;;  %v110_v60 = vpop.trf.xlu1 }
  0xc9   :  { %v131_v62 = vmul.f32 %v622_v38, %v110_v60 }
  0xcb   :  { %v80_v63 = vpop.trf.xlu0 }
  0xcc   :  { %v134_v0 = vmul.f32 %v622_v38, %v80_v63  ;;  %v356_v63 = vmax.f32 %v324_v59, 0.0 }
  0xce   :  { %v166_v2 = vmax.f32 %v134_v0, 0.0  ;;  %389 = vst [vmem:[#allocation5 + $0x120] sm:$0xff] %v356_v63 }
  0xcf   :  { %295 = vxpose.xlu0.b32.cont [10/16] %v247_v1, 128  ;;  %v163_v1 = vmax.f32 %v131_v62, 0.0 }
  0xd0   :  { %198 = vst [vmem:[#allocation5 + $0x40] sm:$0xff] %v166_v2  ;;  %v273_v2 = vpop.trf.xlu2 }
  0xd1   :  { %195 = vst [vmem:[#allocation5 + $0x28] sm:$0xff] %v163_v1  ;;  %v326_v4 = vmul.f32 %v714_v37, %v273_v2 }
  0xd3   :  { %v81_v5 = vpop.trf.xlu0 }
  0xd4   :  { %v136_v6 = vmul.f32 %v622_v38, %v81_v5  ;;  %v111_v5 = vpop.trf.xlu1 }
  0xd6   :  { %v168_v8 = vmax.f32 %v136_v6, 0.0 }
  0xd7   :  { %296 = vxpose.xlu0.b32.cont [11/16] %v248_v7, 128  ;;  %v133_v7 = vmul.f32 %v622_v38, %v111_v5 }
  0xd8   :  { %200 = vst [vmem:[#allocation5 + $0x50] sm:$0xff] %v168_v8  ;;  %v358_v8 = vmax.f32 %v326_v4, 0.0 }
  0xd9   :  { %v165_v10 = vmax.f32 %v133_v7, 0.0 }
  0xda   :  { %391 = vst [vmem:[#allocation5 + $0x130] sm:$0xff] %v358_v8 }
  0xdb   :  { %v82_v11 = vpop.trf.xlu0  ;;  %197 = vst [vmem:[#allocation5 + $0x38] sm:$0xff] %v165_v10 }
  0xdc   :  { %v138_v12 = vmul.f32 %v622_v38, %v82_v11  ;;  %v274_v11 = vpop.trf.xlu2 }
  0xde   :  { %v170_v14 = vmax.f32 %v138_v12, 0.0 }
  0xdf   :  { %297 = vxpose.xlu0.b32.cont [12/16] %v249_v13, 128  ;;  %v328_v13 = vmul.f32 %v714_v37, %v274_v11 }
  0xe0   :  { %202 = vst [vmem:[#allocation5 + $0x60] sm:$0xff] %v170_v14  ;;  %v112_v14 = vpop.trf.xlu1 }
  0xe1   :  { %v135_v16 = vmul.f32 %v622_v38, %v112_v14 }
  0xe3   :  { %v83_v17 = vpop.trf.xlu0 }
  0xe4   :  { %v140_v18 = vmul.f32 %v622_v38, %v83_v17  ;;  %v360_v17 = vmax.f32 %v328_v13, 0.0 }
  0xe6   :  { %v172_v20 = vmax.f32 %v140_v18, 0.0  ;;  %393 = vst [vmem:[#allocation5 + $0x140] sm:$0xff] %v360_v17 }
  0xe7   :  { %298 = vxpose.xlu0.b32.cont [13/16] %v250_v19, 128  ;;  %v167_v19 = vmax.f32 %v135_v16, 0.0 }
  0xe8   :  { %204 = vst [vmem:[#allocation5 + $0x70] sm:$0xff] %v172_v20  ;;  %v275_v20 = vpop.trf.xlu2 }
  0xe9   :  { %199 = vst [vmem:[#allocation5 + $0x48] sm:$0xff] %v167_v19 }
  0xeb   :  { %v84_v22 = vpop.trf.xlu0 }
  0xec   :  { %v142_v23 = vmul.f32 %v622_v38, %v84_v22  ;;  %v330_v22 = vmul.f32 %v714_v37, %v275_v20 }
  0xee   :  { %v174_v25 = vmax.f32 %v142_v23, 0.0  ;;  %v113_v23 = vpop.trf.xlu1 }
  0xef   :  { %299 = vxpose.xlu0.b32.cont [14/16] %v251_v24, 128 }
  0xf0   :  { %206 = vst [vmem:[#allocation5 + $0x80] sm:$0xff] %v174_v25  ;;  %v137_v25 = vmul.f32 %v622_v38, %v113_v23 }
  0xf3   :  { %v85_v26 = vpop.trf.xlu0 }
  0xf4   :  { %v144_v27 = vmul.f32 %v622_v38, %v85_v26  ;;  %v362_v26 = vmax.f32 %v330_v22, 0.0 }
  0xf6   :  { %v176_v29 = vmax.f32 %v144_v27, 0.0  ;;  %395 = vst [vmem:[#allocation5 + $0x150] sm:$0xff] %v362_v26 }
  0xf7   :  { %300 = vxpose.xlu0.b32.cont [15/16] %v252_v28, 128  ;;  %v169_v28 = vmax.f32 %v137_v25, 0.0 }
  0xf8   :  { %208 = vst [vmem:[#allocation5 + $0x90] sm:$0xff] %v176_v29  ;;  %v276_v29 = vpop.trf.xlu2 }
  0xf9   :  { %201 = vst [vmem:[#allocation5 + $0x58] sm:$0xff] %v169_v28 }
  0xfb   :  { %v86_v30 = vpop.trf.xlu0 }
  0xfc   :  { %v146_v31 = vmul.f32 %v622_v38, %v86_v30 }
  0xfe   :  { %v178_v33 = vmax.f32 %v146_v31, 0.0  ;;  %v332_v31 = vmul.f32 %v714_v37, %v276_v29 }
  0xff   :  { %301 = vxpose.xlu0.b32.end [16/16] %v253_v32, 128  ;;  %v114_v32 = vpop.trf.xlu1 }
 0x100   :  { %210 = vst [vmem:[#allocation5 + $0xa0] sm:$0xff] %v178_v33 }
 0x103   :  { %v87_v34 = vpop.trf.xlu0 }
 0x104   :  { %v148_v35 = vmul.f32 %v622_v38, %v87_v34  ;;  %v139_v34 = vmul.f32 %v622_v38, %v114_v32 }
 0x106   :  { %v180_v36 = vmax.f32 %v148_v35, 0.0  ;;  %v364_v35 = vmax.f32 %v332_v31, 0.0  ;;  %v171_v39 = vmax.f32 %v139_v34, 0.0 }
 0x108   :  { %212 = vst [vmem:[#allocation5 + $0xb0] sm:$0xff] %v180_v36 }
 0x109   :  { %397 = vst [vmem:[#allocation5 + $0x160] sm:$0xff] %v364_v35 }
 0x10a   :  { %203 = vst [vmem:[#allocation5 + $0x68] sm:$0xff] %v171_v39 }
 0x10b   :  { %v88_v40 = vpop.trf.xlu0 }
 0x10c   :  { %v150_v43 = vmul.f32 %v622_v38, %v88_v40  ;;  %v277_v40 = vpop.trf.xlu2 }
 0x10d   :  { %v334_v42 = vmul.f32 %v714_v37, %v277_v40 }
 0x10e   :  { %v182_v46 = vmax.f32 %v150_v43, 0.0  ;;  %v115_v43 = vpop.trf.xlu1 }
 0x10f   :  { %v141_v45 = vmul.f32 %v622_v38, %v115_v43 }
 0x110   :  { %214 = vst [vmem:[#allocation5 + $0xc0] sm:$0xff] %v182_v46  ;;  %v366_v46 = vmax.f32 %v334_v42, 0.0 }
 0x111   :  { %v173_v48 = vmax.f32 %v141_v45, 0.0 }
 0x112   :  { %399 = vst [vmem:[#allocation5 + $0x170] sm:$0xff] %v366_v46 }
 0x113   :  { %v89_v49 = vpop.trf.xlu0  ;;  %205 = vst [vmem:[#allocation5 + $0x78] sm:$0xff] %v173_v48 }
 0x114   :  { %v152_v52 = vmul.f32 %v622_v38, %v89_v49  ;;  %v278_v49 = vpop.trf.xlu2 }
 0x115   :  { %v336_v51 = vmul.f32 %v714_v37, %v278_v49 }
 0x116   :  { %v184_v55 = vmax.f32 %v152_v52, 0.0  ;;  %v116_v52 = vpop.trf.xlu1 }
 0x117   :  { %v143_v54 = vmul.f32 %v622_v38, %v116_v52 }
 0x118   :  { %216 = vst [vmem:[#allocation5 + $0xd0] sm:$0xff] %v184_v55  ;;  %v368_v55 = vmax.f32 %v336_v51, 0.0 }
 0x119   :  { %v175_v57 = vmax.f32 %v143_v54, 0.0 }
 0x11a   :  { %401 = vst [vmem:[#allocation5 + $0x180] sm:$0xff] %v368_v55 }
 0x11b   :  { %v90_v58 = vpop.trf.xlu0  ;;  %207 = vst [vmem:[#allocation5 + $0x88] sm:$0xff] %v175_v57 }
 0x11c   :  { %v154_v61 = vmul.f32 %v622_v38, %v90_v58  ;;  %v279_v58 = vpop.trf.xlu2 }
 0x11d   :  { %v338_v60 = vmul.f32 %v714_v37, %v279_v58 }
 0x11e   :  { %v186_v0 = vmax.f32 %v154_v61, 0.0  ;;  %v117_v61 = vpop.trf.xlu1 }
 0x11f   :  { %v145_v63 = vmul.f32 %v622_v38, %v117_v61 }
 0x120   :  { %218 = vst [vmem:[#allocation5 + $0xe0] sm:$0xff] %v186_v0  ;;  %v370_v0 = vmax.f32 %v338_v60, 0.0 }
 0x121   :  { %v177_v2 = vmax.f32 %v145_v63, 0.0 }
 0x122   :  { %403 = vst [vmem:[#allocation5 + $0x190] sm:$0xff] %v370_v0 }
 0x123   :  { %v91_v3 = vpop.trf.xlu0  ;;  %209 = vst [vmem:[#allocation5 + $0x98] sm:$0xff] %v177_v2 }
 0x124   :  { %v156_v6 = vmul.f32 %v622_v38, %v91_v3  ;;  %v280_v3 = vpop.trf.xlu2 }
 0x125   :  { %v340_v5 = vmul.f32 %v714_v37, %v280_v3 }
 0x126   :  { %v188_v9 = vmax.f32 %v156_v6, 0.0  ;;  %v118_v6 = vpop.trf.xlu1 }
 0x127   :  { %v147_v8 = vmul.f32 %v622_v38, %v118_v6 }
 0x128   :  { %220 = vst [vmem:[#allocation5 + $0xf0] sm:$0xff] %v188_v9  ;;  %v372_v9 = vmax.f32 %v340_v5, 0.0 }
 0x129   :  { %v179_v11 = vmax.f32 %v147_v8, 0.0 }
 0x12a   :  { %405 = vst [vmem:[#allocation5 + $0x1a0] sm:$0xff] %v372_v9 }
 0x12b   :  { %v302_v12 = vpop.trf.xlu0  ;;  %211 = vst [vmem:[#allocation5 + $0xa8] sm:$0xff] %v179_v11 }
 0x12c   :  { %v321_v15 = vmul.f32 %v714_v37, %v302_v12  ;;  %v281_v12 = vpop.trf.xlu2 }
 0x12d   :  { %v342_v14 = vmul.f32 %v714_v37, %v281_v12 }
 0x12e   :  { %v353_v18 = vmax.f32 %v321_v15, 0.0  ;;  %v119_v15 = vpop.trf.xlu1 }
 0x12f   :  { %v149_v17 = vmul.f32 %v622_v38, %v119_v15 }
 0x130   :  { %386 = vst [vmem:[#allocation5 + $0x108] sm:$0xff] %v353_v18  ;;  %v374_v18 = vmax.f32 %v342_v14, 0.0 }
 0x131   :  { %v181_v20 = vmax.f32 %v149_v17, 0.0 }
 0x132   :  { %407 = vst [vmem:[#allocation5 + $0x1b0] sm:$0xff] %v374_v18 }
 0x133   :  { %v303_v21 = vpop.trf.xlu0  ;;  %213 = vst [vmem:[#allocation5 + $0xb8] sm:$0xff] %v181_v20 }
 0x134   :  { %v323_v24 = vmul.f32 %v714_v37, %v303_v21  ;;  %v282_v21 = vpop.trf.xlu2 }
 0x135   :  { %v344_v23 = vmul.f32 %v714_v37, %v282_v21 }
 0x136   :  { %v355_v27 = vmax.f32 %v323_v24, 0.0  ;;  %v120_v24 = vpop.trf.xlu1 }
 0x137   :  { %v151_v26 = vmul.f32 %v622_v38, %v120_v24 }
 0x138   :  { %388 = vst [vmem:[#allocation5 + $0x118] sm:$0xff] %v355_v27  ;;  %v376_v27 = vmax.f32 %v344_v23, 0.0 }
 0x139   :  { %v183_v29 = vmax.f32 %v151_v26, 0.0 }
 0x13a   :  { %409 = vst [vmem:[#allocation5 + $0x1c0] sm:$0xff] %v376_v27 }
 0x13b   :  { %v304_v30 = vpop.trf.xlu0  ;;  %215 = vst [vmem:[#allocation5 + $0xc8] sm:$0xff] %v183_v29 }
 0x13c   :  { %v325_v33 = vmul.f32 %v714_v37, %v304_v30  ;;  %v283_v30 = vpop.trf.xlu2 }
 0x13d   :  { %v346_v32 = vmul.f32 %v714_v37, %v283_v30 }
 0x13e   :  { %v357_v36 = vmax.f32 %v325_v33, 0.0  ;;  %v121_v33 = vpop.trf.xlu1 }
 0x13f   :  { %v153_v35 = vmul.f32 %v622_v38, %v121_v33 }
 0x140   :  { %390 = vst [vmem:[#allocation5 + $0x128] sm:$0xff] %v357_v36  ;;  %v378_v36 = vmax.f32 %v346_v32, 0.0 }
 0x141   :  { %v185_v40 = vmax.f32 %v153_v35, 0.0 }
 0x142   :  { %411 = vst [vmem:[#allocation5 + $0x1d0] sm:$0xff] %v378_v36 }
 0x143   :  { %v305_v41 = vpop.trf.xlu0  ;;  %217 = vst [vmem:[#allocation5 + $0xd8] sm:$0xff] %v185_v40 }
 0x144   :  { %v327_v44 = vmul.f32 %v714_v37, %v305_v41  ;;  %v284_v41 = vpop.trf.xlu2 }
 0x145   :  { %v348_v43 = vmul.f32 %v714_v37, %v284_v41 }
 0x146   :  { %v359_v47 = vmax.f32 %v327_v44, 0.0  ;;  %v122_v44 = vpop.trf.xlu1 }
 0x147   :  { %v155_v46 = vmul.f32 %v622_v38, %v122_v44 }
 0x148   :  { %392 = vst [vmem:[#allocation5 + $0x138] sm:$0xff] %v359_v47  ;;  %v380_v47 = vmax.f32 %v348_v43, 0.0 }
 0x149   :  { %v187_v49 = vmax.f32 %v155_v46, 0.0 }
 0x14a   :  { %413 = vst [vmem:[#allocation5 + $0x1e0] sm:$0xff] %v380_v47 }
 0x14b   :  { %v306_v50 = vpop.trf.xlu0  ;;  %219 = vst [vmem:[#allocation5 + $0xe8] sm:$0xff] %v187_v49 }
 0x14c   :  { %v329_v53 = vmul.f32 %v714_v37, %v306_v50  ;;  %v285_v50 = vpop.trf.xlu2 }
 0x14d   :  { %v350_v52 = vmul.f32 %v714_v37, %v285_v50 }
 0x14e   :  { %v361_v56 = vmax.f32 %v329_v53, 0.0  ;;  %v123_v53 = vpop.trf.xlu1 }
 0x14f   :  { %v157_v55 = vmul.f32 %v622_v38, %v123_v53 }
 0x150   :  { %394 = vst [vmem:[#allocation5 + $0x148] sm:$0xff] %v361_v56  ;;  %v382_v56 = vmax.f32 %v350_v52, 0.0 }
 0x151   :  { %v189_v58 = vmax.f32 %v157_v55, 0.0 }
 0x152   :  { %415 = vst [vmem:[#allocation5 + $0x1f0] sm:$0xff] %v382_v56 }
 0x153   :  { %v307_v59 = vpop.trf.xlu0  ;;  %221 = vst [vmem:[#allocation5 + $0xf8] sm:$0xff] %v189_v58 }
 0x154   :  { %v331_v62 = vmul.f32 %v714_v37, %v307_v59 }
 0x156   :  { %v363_v1 = vmax.f32 %v331_v62, 0.0 }
 0x158   :  { %396 = vst [vmem:[#allocation5 + $0x158] sm:$0xff] %v363_v1 }
 0x15b   :  { %v308_v4 = vpop.trf.xlu0 }
 0x15c   :  { %v333_v7 = vmul.f32 %v714_v37, %v308_v4 }
 0x15e   :  { %v365_v10 = vmax.f32 %v333_v7, 0.0 }
 0x160   :  { %398 = vst [vmem:[#allocation5 + $0x168] sm:$0xff] %v365_v10 }
 0x163   :  { %v309_v13 = vpop.trf.xlu0 }
 0x164   :  { %v335_v16 = vmul.f32 %v714_v37, %v309_v13 }
 0x166   :  { %v367_v19 = vmax.f32 %v335_v16, 0.0 }
 0x168   :  { %400 = vst [vmem:[#allocation5 + $0x178] sm:$0xff] %v367_v19 }
 0x16b   :  { %v310_v22 = vpop.trf.xlu0 }
 0x16c   :  { %v337_v25 = vmul.f32 %v714_v37, %v310_v22 }
 0x16e   :  { %v369_v28 = vmax.f32 %v337_v25, 0.0 }
 0x170   :  { %402 = vst [vmem:[#allocation5 + $0x188] sm:$0xff] %v369_v28 }
 0x173   :  { %v311_v31 = vpop.trf.xlu0 }
 0x174   :  { %v339_v34 = vmul.f32 %v714_v37, %v311_v31 }
 0x176   :  { %v371_v39 = vmax.f32 %v339_v34, 0.0 }
 0x178   :  { %404 = vst [vmem:[#allocation5 + $0x198] sm:$0xff] %v371_v39 }
 0x17b   :  { %v312_v42 = vpop.trf.xlu0 }
 0x17c   :  { %v341_v45 = vmul.f32 %v714_v37, %v312_v42 }
 0x17e   :  { %v373_v48 = vmax.f32 %v341_v45, 0.0 }
 0x180   :  { %406 = vst [vmem:[#allocation5 + $0x1a8] sm:$0xff] %v373_v48 }
 0x183   :  { %v313_v51 = vpop.trf.xlu0 }
 0x184   :  { %v343_v54 = vmul.f32 %v714_v37, %v313_v51 }
 0x186   :  { %v375_v57 = vmax.f32 %v343_v54, 0.0 }
 0x188   :  { %408 = vst [vmem:[#allocation5 + $0x1b8] sm:$0xff] %v375_v57 }
 0x18b   :  { %v314_v59 = vpop.trf.xlu0 }
 0x18c   :  { %v345_v60 = vmul.f32 %v714_v37, %v314_v59 }
 0x18e   :  { %v377_v61 = vmax.f32 %v345_v60, 0.0 }
 0x190   :  { %410 = vst [vmem:[#allocation5 + $0x1c8] sm:$0xff] %v377_v61 }
 0x193   :  { %v315_v62 = vpop.trf.xlu0 }
 0x194   :  { %v347_v63 = vmul.f32 %v714_v37, %v315_v62 }
 0x196   :  { %v379_v0 = vmax.f32 %v347_v63, 0.0 }
 0x198   :  { %412 = vst [vmem:[#allocation5 + $0x1d8] sm:$0xff] %v379_v0 }
 0x19b   :  { %v316_v1 = vpop.trf.xlu0 }
 0x19c   :  { %v349_v2 = vmul.f32 %v714_v37, %v316_v1 }
 0x19e   :  { %v381_v38 = vmax.f32 %v349_v2, 0.0 }
 0x1a0   :  { %414 = vst [vmem:[#allocation5 + $0x1e8] sm:$0xff] %v381_v38 }
 0x1a3   :  { %v317_v3 = vpop.trf.xlu0 }
 0x1a4   :  { %v351_v4 = vmul.f32 %v714_v37, %v317_v3 }
 0x1a6   :  { %v383_v5 = vmax.f32 %v351_v4, 0.0 }
 0x1a8   :  { %416 = vst [vmem:[#allocation5 + $0x1f8] sm:$0xff] %v383_v5 }
 0x1a9   :  { %429 = dma.vmem_to_hbm [thread:$0]  %s422_s5, 8192, %s424_s8, [#allocation3], %s483_s9, %s483_s9, %s484_s10  }
 0x1aa   :  { %479 = dma.done.wait [#allocation3], 8192  }
 0x1ab   :  { %480 = vsyncadd [#allocation3], 4294959104 }
 0x1ac   :  { %434 = vsyncpa [#allocation3], 1 }
 0x1ad   :  { %435 = vsyncpa [#allocation4], 1 }

</bundles_post_ra>
